<compile_context>
chip_gen: v7x
topology: tpu7x:2x2x1
jax: 0.10.0
libtpu: 0.0.40
codegen_flags: <defaults>
</compile_context>

<pallas_src>
import functools

import jax
import jax.numpy as jnp
from jax.experimental import pallas as pl
from jax.experimental.pallas import tpu as pltpu


def _focal_loss_kernel(x_ref, t_ref, w_ref, num_ref, den_ref,
                       *, gamma, ignore_index, n_rows, tile_n,
                       tiles_per_group):
    g = pl.program_id(0)
    i = pl.program_id(1)

    # The (8,128) per-group accumulator blocks are resident across the inner
    # (reduction) axis; zero them at the start of each group's sweep.
    @pl.when(i == 0)
    def _():
        num_ref[...] = jnp.zeros_like(num_ref)
        den_ref[...] = jnp.zeros_like(den_ref)

    x = x_ref[...].astype(jnp.float32)           # (TN, C) f32
    t = t_ref[...]                               # (TN, 1) int32
    wt = w_ref[...]                              # (TN, 1) f32 = weight[target]

    # log-sum-exp over the class (lane) axis — single full-tile exp pass.
    m = jnp.max(x, axis=-1, keepdims=True)       # (TN, 1)
    e = jnp.exp(x - m)                           # (TN, C)
    lse = jnp.log(jnp.sum(e, axis=-1, keepdims=True))   # (TN, 1)

    # Gather the logit at the target class with a one-hot select (no per-row
    # dynamic gather on TPU); everything after this is (TN, 1) only.
    col = jax.lax.broadcasted_iota(jnp.int32, x.shape, 1)        # (TN, C)
    x_t = jnp.sum(jnp.where(col == t, x, 0.0), axis=-1, keepdims=True)

    logpt_t = x_t - m - lse                      # (TN, 1), <= 0
    pt_t = jnp.exp(logpt_t)                      # (TN, 1), tiny EUP pass
    omp = jnp.maximum(1.0 - pt_t, 0.0)           # clamp f32 rounding noise

    # (1 - pt)**gamma : integer gamma (the default gamma=2) uses repeated
    # multiplies starting from omp itself (gamma=2 -> 1 multiply).
    g_int = int(round(gamma))
    if abs(float(gamma) - g_int) < 1e-12 and 0 <= g_int <= 16:
        if g_int == 0:
            factor = jnp.ones_like(omp)
        else:
            factor = omp
            for _ in range(g_int - 1):
                factor = factor * omp
    else:
        factor = jnp.power(omp, gamma)
    focal_t = factor * logpt_t                   # (TN, 1)

    # Row validity: inside the real [0, N) range (ragged last tile and the
    # clamped "padding" tile of the 2-way group split) and not ignore_index.
    # where-select (not multiply) so garbage rows can never inject NaN/Inf.
    row0 = (g * tiles_per_group + i) * tile_n
    row = row0 + jax.lax.broadcasted_iota(jnp.int32, t.shape, 0)
    valid = (row < n_rows) & (t != ignore_index)

    # Per-step reduction to (1,1), then a single lane-dense broadcast-add into
    # the (8,128) group accumulator (every element carries the running sum).
    num_step = jnp.sum(jnp.where(valid, wt * focal_t, 0.0),
                       axis=0, keepdims=True)    # (1, 1)
    den_step = jnp.sum(jnp.where(valid, wt, 0.0),
                       axis=0, keepdims=True)    # (1, 1)
    num_ref[...] = num_ref[...] + num_step
    den_ref[...] = den_ref[...] + den_step


def _tile_and_vmem(n_rows, n_classes, itemsize):
    """Generation-aware row-tile size and VMEM limit.

    Budget ~25% of the per-core VMEM capacity (128 MiB on v5e/v6e, 64 MiB on
    v7x) for the logits row tile, accounting for the double-buffered input
    block, the f32 temporaries of the exp/lse pass, and the lane-sparse
    (TN,1) f32 intermediates that spill to VMEM in (8,128)-tiled layout.
    """
    try:
        vmem_cap = int(pltpu.get_tpu_info().vmem_capacity_bytes)
    except Exception:
        vmem_cap = 64 * 1024 * 1024          # conservative: v7x per-core
    budget = vmem_cap // 4

    bytes_per_row = (n_classes * (2 * itemsize + 12)   # 2x input buf + f32 temps
                     + 16                              # target / weight blocks
                     + 6 * 512)                        # spilled (TN,1) f32 vectors
    cap_rows = max(8, budget // max(bytes_per_row, 1))
    cap_rows = min(int(cap_rows), 8192)
    cap_rows = max(8, (cap_rows // 8) * 8)
    need = max(8, ((n_rows + 7) // 8) * 8)
    tile_n = min(cap_rows, need)

    footprint = tile_n * bytes_per_row + (2 << 20)     # + margin
    vmem_limit = int(min(int(0.85 * vmem_cap), max(2 * footprint, 32 << 20)))
    return tile_n, vmem_limit


def focal_loss(logits, target, weight=None, *, gamma=2.0, ignore_index=-100,
               tile_n=None):
    """logits: [N, C] float (f32 or bf16); target: [N] int; weight: [C] or None."""
    N, C = logits.shape
    if weight is None:
        weight = jnp.ones((C,), jnp.float32)
    weight = weight.astype(jnp.float32)

    target = target.astype(jnp.int32)
    safe_t = jnp.where(target != ignore_index, target, 0)
    # Per-row class weight gathered in XLA (an N-element op) instead of an
    # in-kernel (TN, C) one-hot select+reduce.
    w_t = weight[safe_t].reshape(N, 1)
    target2d = target.reshape(N, 1)

    itemsize = jnp.dtype(logits.dtype).itemsize
    auto_tile, vmem_limit = _tile_and_vmem(N, C, itemsize)
    if tile_n is None:
        tile_n = auto_tile

    tiles_total = -(-N // tile_n)
    # Always split the row loop 2 ways when there is more than one tile so the
    # "parallel" group axis can shard across v7x's 2 TensorCores.  Odd tile
    # counts get one fully-masked padding tile; its input block index is
    # clamped so every DMA stays in bounds, and the in-kernel row mask zeroes
    # its contribution.  (Harmless sequential overhang on v5e/v6e.)
    n_groups = 2 if tiles_total >= 2 else 1
    tpg = -(-tiles_total // n_groups)
    last_blk = tiles_total - 1

    def row_map(g, i):
        return (jnp.minimum(g * tpg + i, last_blk), 0)

    kernel = functools.partial(
        _focal_loss_kernel,
        gamma=float(gamma),
        ignore_index=int(ignore_index),
        n_rows=N,
        tile_n=tile_n,
        tiles_per_group=tpg,
    )

    cost = pl.CostEstimate(
        flops=int(8 * N * C + 16 * N),
        transcendentals=int(N * C + 2 * N),
        bytes_accessed=int(N * C * itemsize + 8 * N + 2 * n_groups * 8 * 128 * 4),
    )

    num_out, den_out = pl.pallas_call(
        kernel,
        out_shape=(
            jax.ShapeDtypeStruct((n_groups * 8, 128), jnp.float32),
            jax.ShapeDtypeStruct((n_groups * 8, 128), jnp.float32),
        ),
        grid_spec=pltpu.PrefetchScalarGridSpec(
            num_scalar_prefetch=0,
            grid=(n_groups, tpg),
            in_specs=[
                pl.BlockSpec((tile_n, C), row_map),
                pl.BlockSpec((tile_n, 1), row_map),
                pl.BlockSpec((tile_n, 1), row_map),
            ],
            out_specs=[
                pl.BlockSpec((8, 128), lambda g, i: (g, 0)),
                pl.BlockSpec((8, 128), lambda g, i: (g, 0)),
            ],
        ),
        compiler_params=pltpu.CompilerParams(
            dimension_semantics=("parallel", "arbitrary"),
            vmem_limit_bytes=vmem_limit,
        ),
        cost_estimate=cost,
    )(logits, target2d, w_t)

    # Every element of a group's (8,128) block holds that group's running sum;
    # read one element per group.  Tiny final reductions + divide stay in XLA.
    num = jnp.sum(num_out[0::8, 0])
    den = jnp.sum(den_out[0::8, 0])
    # NB: if every row has target == ignore_index, den == 0 and the result is
    # NaN — this matches PyTorch's nll_loss 'mean' behavior.
    return -(num / den)


def _focal_loss_ref(logits, target, weight=None, *, gamma=2.0,
                    ignore_index=-100):
    """Pure-JAX reference matching PyTorch semantics."""
    N, C = logits.shape
    if weight is None:
        weight = jnp.ones((C,), jnp.float32)
    weight = weight.astype(jnp.float32)
    logpt = jax.nn.log_softmax(logits.astype(jnp.float32), axis=1)
    pt = jnp.exp(logpt)
    focal = (1.0 - pt) ** gamma * logpt
    valid = target != ignore_index
    safe_t = jnp.where(valid, target, 0)
    picked = focal[jnp.arange(N), safe_t]
    w = weight[safe_t]
    num = jnp.sum(jnp.where(valid, w * picked, 0.0))
    den = jnp.sum(jnp.where(valid, w, 0.0))
    return -num / den


if __name__ == "__main__":
    key = jax.random.PRNGKey(0)
    k1, k2, k3, k4, k5, k6, k7 = jax.random.split(key, 7)

    # Case 1: module-default config (gamma=2, no weight), one ignored row,
    # auto tile sizing (single tile, single group).
    N, C = 8, 32
    logits = jax.random.normal(k1, (N, C), dtype=jnp.float32)
    target = jax.random.randint(k2, (N,), 0, C, dtype=jnp.int32)
    target = target.at[3].set(-100)
    loss = jax.block_until_ready(focal_loss(logits, target))
    ref = _focal_loss_ref(logits, target)
    assert jnp.allclose(loss, ref, atol=1e-5, rtol=1e-5), (loss, ref)

    # Case 2: per-class weights, integer gamma=3, even tile count -> 2-way
    # parallel group axis with no padding (tile_n forced small on purpose).
    N2 = 32
    logits2 = 3.0 * jax.random.normal(k3, (N2, C), dtype=jnp.float32)
    target2 = jax.random.randint(k4, (N2,), 0, C, dtype=jnp.int32)
    target2 = target2.at[0].set(-100).at[17].set(-100)
    weight2 = jax.random.uniform(k5, (C,), minval=0.5, maxval=2.0,
                                 dtype=jnp.float32)
    loss2 = jax.block_until_ready(
        focal_loss(logits2, target2, weight2, gamma=3, tile_n=8))
    ref2 = _focal_loss_ref(logits2, target2, weight2, gamma=3)
    assert jnp.allclose(loss2, ref2, atol=1e-5, rtol=1e-5), (loss2, ref2)

    # Case 3: odd tile count (3 tiles) -> forced 2-way group split with one
    # clamped/fully-masked padding tile; non-integer gamma exercises the
    # jnp.power path.
    N3 = 24
    logits3 = 2.0 * jax.random.normal(k6, (N3, C), dtype=jnp.float32)
    target3 = jax.random.randint(k7, (N3,), 0, C, dtype=jnp.int32)
    target3 = target3.at[5].set(-100)
    loss3 = jax.block_until_ready(
        focal_loss(logits3, target3, weight2, gamma=2.5, tile_n=8))
    ref3 = _focal_loss_ref(logits3, target3, weight2, gamma=2.5)
    assert jnp.allclose(loss3, ref3, atol=1e-5, rtol=1e-5), (loss3, ref3)

    print("KERNEL_OK")
</pallas_src>

<mosaic_0001>
module attributes {stable_mosaic.version = 11 : i64} {
  func.func @_focal_loss_kernel(%arg0: i32, %arg1: i32, %arg2: memref<8x32xf32, #tpu.memory_space<vmem>>, %arg3: memref<8x1xi32, #tpu.memory_space<vmem>>, %arg4: memref<8x1xf32, #tpu.memory_space<vmem>>, %arg5: memref<8x128xf32, #tpu.memory_space<vmem>>, %arg6: memref<8x128xf32, #tpu.memory_space<vmem>>) attributes {dimension_semantics = [#tpu.dimension_semantics<parallel>, #tpu.dimension_semantics<arbitrary>], iteration_bounds = array<i64: 1, 1>, scalar_prefetch = 0 : i64, scratch_operands = 0 : i64, tpu.core_type = #tpu.core_type<tc>, window_params = [{transform_indices = @transform_0, window_bounds = array<i64: 8, 32>}, {transform_indices = @transform_1, window_bounds = array<i64: 8, 1>}, {transform_indices = @transform_2, window_bounds = array<i64: 8, 1>}, {transform_indices = @transform_3, window_bounds = array<i64: 8, 128>}, {transform_indices = @transform_4, window_bounds = array<i64: 8, 128>}]} {
    %c0_i32 = arith.constant 0 : i32
    %0 = arith.cmpi eq, %arg1, %c0_i32 : i32
    %1 = arith.extui %0 : i1 to i32
    %c0_i32_0 = arith.constant 0 : i32
    %2 = arith.cmpi ne, %1, %c0_i32_0 : i32
    scf.if %2 {
      %cst_24 = arith.constant 0.000000e+00 : f32
      %58 = vector.broadcast %cst_24 : f32 to vector<8x128xf32>
      %c0_25 = arith.constant 0 : index
      %c0_26 = arith.constant 0 : index
      %59 = vector.load %arg5[%c0_25, %c0_26] : memref<8x128xf32, #tpu.memory_space<vmem>>, vector<8x128xf32>
      tpu.vector_store %arg5[%c0_25, %c0_26], %58 {strides = array<i32>} : memref<8x128xf32, #tpu.memory_space<vmem>>, vector<8x128xf32>,
      %cst_27 = arith.constant 0.000000e+00 : f32
      %60 = vector.broadcast %cst_27 : f32 to vector<8x128xf32>
      %c0_28 = arith.constant 0 : index
      %c0_29 = arith.constant 0 : index
      %61 = vector.load %arg6[%c0_28, %c0_29] : memref<8x128xf32, #tpu.memory_space<vmem>>, vector<8x128xf32>
      tpu.vector_store %arg6[%c0_28, %c0_29], %60 {strides = array<i32>} : memref<8x128xf32, #tpu.memory_space<vmem>>, vector<8x128xf32>,
    } else {
    }
    %c0 = arith.constant 0 : index
    %c0_1 = arith.constant 0 : index
    %3 = vector.load %arg2[%c0, %c0_1] : memref<8x32xf32, #tpu.memory_space<vmem>>, vector<8x32xf32>
    %c0_2 = arith.constant 0 : index
    %c0_3 = arith.constant 0 : index
    %4 = vector.load %arg3[%c0_2, %c0_3] : memref<8x1xi32, #tpu.memory_space<vmem>>, vector<8x1xi32>
    %c0_4 = arith.constant 0 : index
    %c0_5 = arith.constant 0 : index
    %5 = vector.load %arg4[%c0_4, %c0_5] : memref<8x1xf32, #tpu.memory_space<vmem>>, vector<8x1xf32>
    %cst = arith.constant dense<0xFF800000> : vector<8xf32>
    %6 = vector.multi_reduction <maximumf>, %3, %cst [1] : vector<8x32xf32> to vector<8xf32>
    %7 = vector.shape_cast %6 : vector<8xf32> to vector<8x1xf32>
    %8 = vector.broadcast %7 : vector<8x1xf32> to vector<8x32xf32>
    %9 = arith.subf %3, %8 : vector<8x32xf32>
    %10 = math.exp %9 : vector<8x32xf32>
    %cst_6 = arith.constant dense<0.000000e+00> : vector<8xf32>
    %11 = vector.multi_reduction <add>, %10, %cst_6 [1] : vector<8x32xf32> to vector<8xf32>
    %12 = vector.shape_cast %11 : vector<8xf32> to vector<8x1xf32>
    %13 = math.log %12 : vector<8x1xf32>
    %14 = tpu.iota {dimensions = array<i32: 1>} : vector<8x32xi32>
    %15 = vector.broadcast %4 : vector<8x1xi32> to vector<8x32xi32>
    %16 = arith.cmpi eq, %14, %15 : vector<8x32xi32>
    %cst_7 = arith.constant 0.000000e+00 : f32
    %17 = vector.broadcast %cst_7 : f32 to vector<8x32xf32>
    %18 = arith.select %16, %3, %17 : vector<8x32xi1>, vector<8x32xf32>
    %cst_8 = arith.constant dense<0.000000e+00> : vector<8xf32>
    %19 = vector.multi_reduction <add>, %18, %cst_8 [1] : vector<8x32xf32> to vector<8xf32>
    %20 = vector.shape_cast %19 : vector<8xf32> to vector<8x1xf32>
    %21 = arith.subf %20, %7 : vector<8x1xf32>
    %22 = arith.subf %21, %13 : vector<8x1xf32>
    %23 = math.exp %22 : vector<8x1xf32>
    %cst_9 = arith.constant 1.000000e+00 : f32
    %24 = vector.broadcast %cst_9 : f32 to vector<8x1xf32>
    %25 = arith.subf %24, %23 : vector<8x1xf32>
    %cst_10 = arith.constant 0.000000e+00 : f32
    %26 = vector.broadcast %cst_10 : f32 to vector<8x1xf32>
    %27 = arith.maximumf %25, %26 : vector<8x1xf32>
    %28 = arith.mulf %27, %27 : vector<8x1xf32>
    %29 = arith.mulf %28, %22 : vector<8x1xf32>
    %c1_i32 = arith.constant 1 : i32
    %30 = arith.muli %arg0, %c1_i32 : i32
    %31 = arith.addi %30, %arg1 : i32
    %c8_i32 = arith.constant 8 : i32
    %32 = arith.muli %31, %c8_i32 : i32
    %33 = tpu.iota {dimensions = array<i32: 0>} : vector<8x1xi32>
    %34 = vector.broadcast %32 : i32 to vector<8x1xi32>
    %35 = arith.addi %34, %33 : vector<8x1xi32>
    %c8_i32_11 = arith.constant 8 : i32
    %36 = vector.broadcast %c8_i32_11 : i32 to vector<8x1xi32>
    %37 = arith.cmpi slt, %35, %36 : vector<8x1xi32>
    %c-100_i32 = arith.constant -100 : i32
    %38 = vector.broadcast %c-100_i32 : i32 to vector<8x1xi32>
    %39 = arith.cmpi ne, %4, %38 : vector<8x1xi32>
    %40 = arith.andi %37, %39 : vector<8x1xi1>
    %41 = arith.mulf %5, %29 : vector<8x1xf32>
    %cst_12 = arith.constant 0.000000e+00 : f32
    %42 = vector.broadcast %cst_12 : f32 to vector<8x1xf32>
    %43 = arith.select %40, %41, %42 : vector<8x1xi1>, vector<8x1xf32>
    %cst_13 = arith.constant dense<0.000000e+00> : vector<1xf32>
    %44 = vector.multi_reduction <add>, %43, %cst_13 [0] : vector<8x1xf32> to vector<1xf32>
    %45 = vector.shape_cast %44 : vector<1xf32> to vector<1x1xf32>
    %cst_14 = arith.constant 0.000000e+00 : f32
    %46 = vector.broadcast %cst_14 : f32 to vector<8x1xf32>
    %47 = arith.select %40, %5, %46 : vector<8x1xi1>, vector<8x1xf32>
    %cst_15 = arith.constant dense<0.000000e+00> : vector<1xf32>
    %48 = vector.multi_reduction <add>, %47, %cst_15 [0] : vector<8x1xf32> to vector<1xf32>
    %49 = vector.shape_cast %48 : vector<1xf32> to vector<1x1xf32>
    %c0_16 = arith.constant 0 : index
    %c0_17 = arith.constant 0 : index
    %50 = vector.load %arg5[%c0_16, %c0_17] : memref<8x128xf32, #tpu.memory_space<vmem>>, vector<8x128xf32>
    %51 = vector.broadcast %45 : vector<1x1xf32> to vector<8x128xf32>
    %52 = arith.addf %50, %51 : vector<8x128xf32>
    %c0_18 = arith.constant 0 : index
    %c0_19 = arith.constant 0 : index
    %53 = vector.load %arg5[%c0_18, %c0_19] : memref<8x128xf32, #tpu.memory_space<vmem>>, vector<8x128xf32>
    tpu.vector_store %arg5[%c0_18, %c0_19], %52 {strides = array<i32>} : memref<8x128xf32, #tpu.memory_space<vmem>>, vector<8x128xf32>,
    %c0_20 = arith.constant 0 : index
    %c0_21 = arith.constant 0 : index
    %54 = vector.load %arg6[%c0_20, %c0_21] : memref<8x128xf32, #tpu.memory_space<vmem>>, vector<8x128xf32>
    %55 = vector.broadcast %49 : vector<1x1xf32> to vector<8x128xf32>
    %56 = arith.addf %54, %55 : vector<8x128xf32>
    %c0_22 = arith.constant 0 : index
    %c0_23 = arith.constant 0 : index
    %57 = vector.load %arg6[%c0_22, %c0_23] : memref<8x128xf32, #tpu.memory_space<vmem>>, vector<8x128xf32>
    tpu.vector_store %arg6[%c0_22, %c0_23], %56 {strides = array<i32>} : memref<8x128xf32, #tpu.memory_space<vmem>>, vector<8x128xf32>,
    return
  }
  func.func @transform_0(%arg0: i32, %arg1: i32) -> (i32, i32) {
    %c1_i32 = arith.constant 1 : i32
    %0 = arith.muli %arg0, %c1_i32 : i32
    %1 = arith.addi %0, %arg1 : i32
    %c0_i32 = arith.constant 0 : i32
    %2 = arith.minsi %1, %c0_i32 : i32
    %c0_i32_0 = arith.constant 0 : i32
    %c0_i32_1 = arith.constant 0 : i32
    return %2, %c0_i32_0 : i32, i32
  }
  func.func @transform_1(%arg0: i32, %arg1: i32) -> (i32, i32) {
    %c1_i32 = arith.constant 1 : i32
    %0 = arith.muli %arg0, %c1_i32 : i32
    %1 = arith.addi %0, %arg1 : i32
    %c0_i32 = arith.constant 0 : i32
    %2 = arith.minsi %1, %c0_i32 : i32
    %c0_i32_0 = arith.constant 0 : i32
    %c0_i32_1 = arith.constant 0 : i32
    return %2, %c0_i32_0 : i32, i32
  }
  func.func @transform_2(%arg0: i32, %arg1: i32) -> (i32, i32) {
    %c1_i32 = arith.constant 1 : i32
    %0 = arith.muli %arg0, %c1_i32 : i32
    %1 = arith.addi %0, %arg1 : i32
    %c0_i32 = arith.constant 0 : i32
    %2 = arith.minsi %1, %c0_i32 : i32
    %c0_i32_0 = arith.constant 0 : i32
    %c0_i32_1 = arith.constant 0 : i32
    return %2, %c0_i32_0 : i32, i32
  }
  func.func @transform_3(%arg0: i32, %arg1: i32) -> (i32, i32) {
    %c0_i32 = arith.constant 0 : i32
    %c0_i32_0 = arith.constant 0 : i32
    return %arg0, %c0_i32 : i32, i32
  }
  func.func @transform_4(%arg0: i32, %arg1: i32) -> (i32, i32) {
    %c0_i32 = arith.constant 0 : i32
    %c0_i32_0 = arith.constant 0 : i32
    return %arg0, %c0_i32 : i32, i32
  }
}

</mosaic_0001>

<bundles_post_ra>
// kernel: tpu_custom_call.1
= control target key start
LH: loop header
LB: loop body
LE: loop exit
PB: predicated region body
PF: predicated region fallthrough
CT: control target
= control target key end

     0   :  { %10 = vsyncpa [#allocation3], 0  ;;  %vm108_vm0 = vcmask 261120   ;;  %v287_v2 = vmov 0   ;;  %s351_s0 = inlined_call_operand.vmem [shape: f32[8,32], index: 0, kind: input, shape index: {}]   ;;  %s352_s1 = inlined_call_operand.vmem [shape: s32[8,1], index: 1, kind: input, shape index: {}]   ;;  %s353_s2 = inlined_call_operand.vmem [shape: f32[8,1], index: 2, kind: input, shape index: {}]   ;;  %s354_s3 = inlined_call_operand.hbm [shape: f32[8,128], index: 3, kind: output, shape index: {0}]   ;;  %s355_s4 = inlined_call_operand.hbm [shape: f32[8,128], index: 4, kind: output, shape index: {1}]  }
   0x1   :  { %v105_v0 = vld [vmem:[%s351_s0] sm:$0xff]  ;;  %231 = vset.pattern.permute.xlu0 %v287_v2  ;;  %232 = vset.pattern.permute.xlu1 %v287_v2 }
   0x2   :  { %v109_v1 = vsel %vm108_vm0, %v105_v0, -inf }
   0x3   :  { %11 = vsyncpa [#allocation5], 0  ;;  %110 = vmax.xlane.f32.xlu0 %v109_v1  ;;  %v106_v3 = vld [vmem:[%s352_s1] sm:$0xff]  ;;  %v120_v7 = vlaneseq  ;;  %vm149_vm3 = vcmask 7168   ;;  %s289_s20 = smov [#allocation4]  }
   0x4   :  { %v107_v21 = vld [vmem:[%s353_s2] sm:$0xff]  ;;  %vm145_vm2 = vcmp.ne.s32.totalorder %v106_v3, 4294967196  ;;  %s288_s2 = smov [#allocation2]   ;;  %s197_s21 = sshll.u32 %s289_s20, 4  ;;  %s198_s21 = int_to_ptr.vmem [resolvable:$true] %s197_s21 }
   0x5   :  { %v121_v8 = vand.u32 127, %v120_v7  ;;  %v157_v22 = vsel %vm145_vm2, %v107_v21, 0.0  ;;  %s187_s19 = sshll.u32 %s288_s2, 4  ;;  %s188_s19 = int_to_ptr.vmem [resolvable:$true] %s187_s19 }
   0x6   :  { %v158_v25 = vsel %vm149_vm3, %v157_v22, 0.0  ;;  %s239_s22 = scalar_lea.vmem %s188_s19, 128  ;;  %p244_p1 = scmp.lt.s32.totalorder %s188_s19, %s188_s19 }
   0x7   :  { %v159_v27 = vrot.slane %v158_v25, 4  ;;  %p240_p0 = scmp.ne.s32.totalorder %s188_s19, %s239_s22  ;;  %p245_p2 = scmp.lt.s32.totalorder %s239_s22, %s239_s22 }
   0x9   :  { %v160_v30 = vadd.f32 %v159_v27, %v158_v25  ;;  %p246_p3 = por %p245_p2, %p244_p1 }
   0xb   :  { %v161_v34 = vrot.slane %v160_v30, 2  ;;  %p247_p4 = pnand %p246_p3, %p240_p0 }
   0xd   :  { %v162_v38 = vadd.f32 %v161_v34, %v160_v30 }
   0xf   :  { %v163_v41 = vrot.slane %v162_v38, 1 }
  0x11   :  { %v164_v43 = vadd.f32 %v163_v41, %v162_v38 }
  0x19   :  { %123 = vperm.xlu0 %231, %v106_v3  }
  0x90   :  { %v111_v4 = vpop.xlane.xlu0 %110 }
  0x91   :  { %v112_v5 = vsub.f32 %v105_v0, %v111_v4 }
  0x93   :  { %v113_v6 = vmul.f32 1.442695, %v112_v5 }
  0x95   :  { %233 = vpow2.f32 %v113_v6 }
  0x98   :  { %v124_v9 = vpop.permute.xlu0 %123 }
  0x99   :  { %vm125_vm1 = vcmp.eq.s32.totalorder %v121_v8, %v124_v9 }
  0x9a   :  { %v126_v11 = vsel %vm125_vm1, %v105_v0, 0.0 }
  0x9b   :  { %v127_v13 = vsel %vm108_vm0, %v126_v11, 0.0 }
  0x9f   :  { %v234_v10 = vpop.eup %233 }
  0xa0   :  { %v115_v12 = vsel %vm108_vm0, %v234_v10, 0.0 }
  0xa1   :  { %116 = vadd.xlane.f32.xlu1 %v115_v12 }
  0xa5   :  { %128 = vadd.xlane.f32.xlu1 %v127_v13 }
 0x12e   :  { %v117_v14 = vpop.xlane.xlu1 %116 }
 0x12f   :  { %235 = vlog2.f32 %v117_v14 }
 0x132   :  { %v129_v15 = vpop.xlane.xlu1 %128 }
 0x133   :  { %v130_v18 = vsub.f32 %v129_v15, %v111_v4 }
 0x139   :  { %v236_v16 = vpop.eup %235 }
 0x13a   :  { %v119_v17 = vmul.f32 0.6931472, %v236_v16 }
 0x13c   :  { %v131_v19 = vsub.f32 %v130_v18, %v119_v17 }
 0x13e   :  { %v132_v20 = vmul.f32 1.442695, %v131_v19 }
 0x140   :  { %237 = vpow2.f32 %v132_v20 }
 0x14a   :  { %v238_v23 = vpop.eup %237 }
 0x14b   :  { %v134_v24 = vsub.f32 1.0, %v238_v23 }
 0x14d   :  { %v135_v26 = vmax.f32 %v134_v24, 0.0 }
 0x14f   :  { %v136_v28 = vmul.f32 %v135_v26, %v135_v26 }
 0x151   :  { %v137_v29 = vmul.f32 %v136_v28, %v131_v19 }
 0x153   :  { %v147_v31 = vmul.f32 %v137_v29, %v107_v21 }
 0x155   :  { %v148_v32 = vsel %vm145_vm2, %v147_v31, 0.0 }
 0x156   :  { %v150_v33 = vsel %vm149_vm3, %v148_v32, 0.0 }
 0x157   :  { %v151_v35 = vrot.slane %v150_v33, 4 }
 0x159   :  { %v152_v36 = vadd.f32 %v151_v35, %v150_v33 }
 0x15b   :  { %v153_v37 = vrot.slane %v152_v36, 2 }
 0x15d   :  { %v154_v39 = vadd.f32 %v153_v37, %v152_v36 }
 0x15f   :  { %v155_v40 = vrot.slane %v154_v39, 1 }
 0x161   :  { %v156_v42 = vadd.f32 %v155_v40, %v154_v39 }
 0x163   :  { %168 = vperm.xlu1 %232, %v156_v42  }
 0x167   :  { %176 = vperm.xlu1 %232, %v164_v43  }
 0x1e2   :  { %v169_v44 = vpop.permute.xlu1 %168 }
 0x1e3   :  { %172 = vst [vmem:[#allocation2] sm:$0xff] %v169_v44 }
 0x1e6   :  { %v177_v45 = vpop.permute.xlu1 %176 }
 0x1e7   :  { %250 = shalt.err (!%p247_p4)
}
 0x1e8   :  { %s251_s25 = scalar_lea.hbm %s354_s3, 128 }
 0x1e9   :  { %p252_p5 = scmp.ne.s32.totalorder %s354_s3, %s251_s25  ;;  %p255_p6 = scmp.lt.u32.totalorder %s251_s25, %s354_s3 }
 0x1eb   :  { %p257_p7 = pnand %p255_p6, %p252_p5 }
 0x1ed   :  { %260 = shalt.err (!%p257_p7)
}
 0x1ee   :  { %190 = dma.vmem_to_hbm [thread:$0]  %s188_s19, 128, %s354_s3, [#allocation3]   ;;  %180 = vst [vmem:[#allocation4] sm:$0xff] %v177_v45 }
 0x1ef   :  { %s261_s6 = scalar_lea.vmem %s198_s21, 128  ;;  %p266_p9 = scmp.lt.s32.totalorder %s198_s21, %s198_s21 }
 0x1f0   :  { %p262_p8 = scmp.ne.s32.totalorder %s198_s21, %s261_s6  ;;  %p267_p10 = scmp.lt.s32.totalorder %s261_s6, %s261_s6 }
 0x1f2   :  { %p268_p11 = por %p267_p10, %p266_p9 }
 0x1f4   :  { %p269_p12 = pnand %p268_p11, %p262_p8 }
 0x1f6   :  { %272 = shalt.err (!%p269_p12)
}
 0x1f7   :  { %s273_s9 = scalar_lea.hbm %s355_s4, 128 }
 0x1f8   :  { %p274_p13 = scmp.ne.s32.totalorder %s355_s4, %s273_s9  ;;  %p277_p0 = scmp.lt.u32.totalorder %s273_s9, %s355_s4 }
 0x1fa   :  { %p279_p1 = pnand %p277_p0, %p274_p13 }
 0x1fc   :  { %282 = shalt.err (!%p279_p1)
}
 0x1fd   :  { %200 = dma.vmem_to_hbm [thread:$0]  %s198_s21, 128, %s355_s4, [#allocation5]  }
 0x1fe   :  { %283 = dma.done.wait [#allocation3], 128  }
 0x1ff   :  { %284 = vsyncadd [#allocation3], 4294967168 }
 0x200   :  { %285 = dma.done.wait [#allocation5], 128  }
 0x201   :  { %286 = vsyncadd [#allocation5], 4294967168 }
 0x202   :  { %207 = vsyncpa [#allocation3], 1 }
 0x203   :  { %208 = vsyncpa [#allocation5], 1 }

</bundles_post_ra>
